<compile_context>
chip_gen: v5e
topology: v5e:2x2
jax: 0.10.0
libtpu: 0.0.40
codegen_flags: <defaults>
</compile_context>

<pallas_src>
import jax
import jax.numpy as jnp
from jax.experimental import pallas as pl
from jax.experimental.pallas import tpu as pltpu


# ------------------------------ device queries -------------------------------

def _vmem_capacity_bytes():
    """Physical VMEM per core; falls back to 128 MiB if the query fails."""
    try:
        info = pltpu.get_tpu_info()
        for attr in ("vmem_capacity_bytes", "vmem_bytes", "vmem_size_bytes"):
            v = getattr(info, attr, None)
            if v:
                return int(v)
    except Exception:
        pass
    return 128 * 1024 * 1024


def _pick_bt(batch, per_batch_bytes, target_block_bytes=4 << 20, min_grid=4):
    """Largest divisor of `batch` whose block stays <= ~4 MiB while keeping the
    grid at least min(min_grid, batch) steps (DMA pipelining + v7x 2-TC sharding).
    For awkward (e.g. prime) batch sizes this degrades gracefully to Bt=1."""
    best = 1
    for cand in range(1, batch + 1):
        if batch % cand:
            continue
        if cand > 1 and cand * per_batch_bytes > target_block_bytes:
            break
        if (batch // cand) >= min(min_grid, batch):
            best = cand
    return best


def _pick_tile(n128, c, itemsize, target_bytes=4 << 20, min_grid=4):
    """Spatial tile (multiple of 128 lanes) dividing ceil128(HW); capped at ~4 MiB
    per (C, tile) block and keeping >= min(min_grid, n_tiles) grid steps."""
    best = 1
    for cand in range(1, n128 + 1):
        if n128 % cand:
            continue
        if cand > 1 and cand * 128 * c * itemsize > target_bytes:
            break
        if (n128 // cand) >= min(min_grid, n128):
            best = cand
    return best * 128


# ----------------------- fast path: whole HW per block -----------------------

def _fused_kernel(x_ref, w1_ref, w2_ref, o_ref):
    # x_ref: (Bt, C, HW)   w1_ref: (C, Cr)   w2_ref: (Cr, C)   o_ref: (Bt, C, HW)
    x = x_ref[...]
    xf = x.astype(jnp.float32)                       # f32 accumulation for bf16 x
    bt = x.shape[0]

    avg = jnp.mean(xf, axis=-1)                      # (Bt, C)
    mx = jnp.max(xf, axis=-1)                        # (Bt, C)

    # Fused shared MLP: one (2*Bt, C) pass instead of two M=Bt passes.
    stacked = jnp.concatenate([avg, mx], axis=0)     # (2*Bt, C)
    h = jnp.maximum(
        jnp.dot(stacked, w1_ref[...], preferred_element_type=jnp.float32), 0.0)
    y = jnp.dot(h, w2_ref[...], preferred_element_type=jnp.float32)  # (2*Bt, C)

    att = jax.nn.sigmoid(y[:bt] + y[bt:])            # (Bt, C)
    o_ref[...] = (x * att[:, :, None]).astype(o_ref.dtype)


def _fused_kernel_channels_last(x_ref, w1_ref, w2_ref, o_ref):
    # Lane-dense variant: x_ref/o_ref: (Bt, HW, C) with C on the 128-lane axis.
    x = x_ref[...]
    xf = x.astype(jnp.float32)
    bt = x.shape[0]

    avg = jnp.mean(xf, axis=1)                       # (Bt, C)
    mx = jnp.max(xf, axis=1)                         # (Bt, C)

    stacked = jnp.concatenate([avg, mx], axis=0)     # (2*Bt, C)
    h = jnp.maximum(
        jnp.dot(stacked, w1_ref[...], preferred_element_type=jnp.float32), 0.0)
    y = jnp.dot(h, w2_ref[...], preferred_element_type=jnp.float32)

    att = jax.nn.sigmoid(y[:bt] + y[bt:])            # (Bt, C)
    o_ref[...] = (x * att[:, None, :]).astype(o_ref.dtype)


# ---------------- tiled fallback: pass 1 (stats + gate), pass 2 (scale) ------

def _make_stats_kernel(hw, tile, padded):
    def stats_kernel(x_ref, w1_ref, w2_ref, gate_ref, sum_sc, max_sc):
        # x_ref: (1, C, tile)  gate_ref: (1, 1, C)  scratch: (1, C) each
        j = pl.program_id(1)
        last = pl.num_programs(1) - 1

        @pl.when(j == 0)
        def _():
            sum_sc[...] = jnp.zeros_like(sum_sc)
            max_sc[...] = jnp.full_like(max_sc, -jnp.inf)

        xf = x_ref[0].astype(jnp.float32)             # (C, tile), f32 accumulation

        # Zero padding (<= 127 cols, last tile only) is exact for the sum.
        sum_sc[...] += jnp.sum(xf, axis=-1)[None, :]

        if padded:
            # Interior tiles: no mask work at all.
            @pl.when(j < last)
            def _():
                max_sc[...] = jnp.maximum(
                    max_sc[...], jnp.max(xf, axis=-1)[None, :])

            # Last tile: mask the zero-padded tail out of the max.
            @pl.when(j == last)
            def _():
                pos = j * tile + jax.lax.broadcasted_iota(jnp.int32, (1, tile), 1)
                xm = jnp.where(pos < hw, xf, -jnp.inf)
                max_sc[...] = jnp.maximum(
                    max_sc[...], jnp.max(xm, axis=-1)[None, :])
        else:
            max_sc[...] = jnp.maximum(max_sc[...], jnp.max(xf, axis=-1)[None, :])

        @pl.when(j == last)
        def _():
            avg = sum_sc[...] * (1.0 / hw)                          # (1, C)
            stacked = jnp.concatenate([avg, max_sc[...]], axis=0)   # (2, C)
            h = jnp.maximum(
                jnp.dot(stacked, w1_ref[...],
                        preferred_element_type=jnp.float32), 0.0)
            y = jnp.dot(h, w2_ref[...], preferred_element_type=jnp.float32)
            gate_ref[0] = jax.nn.sigmoid(y[0:1] + y[1:2])           # (1, C)

    return stats_kernel


def _scale_kernel(gate_ref, x_ref, o_ref):
    # gate_ref: (1, 1, C)   x_ref/o_ref: (1, C, tile)
    gate = gate_ref[0, 0][:, None]                                  # (C, 1)
    o_ref[0] = (x_ref[0] * gate).astype(o_ref.dtype)


# --------------------------------- wrapper -----------------------------------

def channel_attention(x, w1, w2, *, vmem_budget_bytes=None, force_tiled=False):
    """x: (B, C, H, W).  w1: (Cr, C), w2: (C, Cr) in PyTorch Linear layout."""
    B, C, H, W = x.shape
    HW = H * W
    Cr = w1.shape[0]

    itemsize = jnp.dtype(x.dtype).itemsize
    w_itemsize = jnp.dtype(w1.dtype).itemsize

    vmem_cap = _vmem_capacity_bytes()
    if vmem_budget_bytes is None:
        # ~96 MiB on 128 MiB parts (v5e/v6e), ~48 MiB on v7x's 64 MiB.
        vmem_budget_bytes = (vmem_cap * 3) // 4
    # Never request more than physical-minus-headroom (and never > 100 MiB).
    vmem_limit_cap = min(vmem_cap - (8 << 20), 100 << 20)

    w1_t = jnp.transpose(w1)                          # (C, Cr)
    w2_t = jnp.transpose(w2)                          # (Cr, C)
    weight_bytes = 2 * 2 * C * Cr * w_itemsize        # both weights, dbl-buffer headroom

    per_batch_bytes = C * HW * itemsize
    fast_fits = (4 * per_batch_bytes + weight_bytes) <= vmem_budget_bytes

    if fast_fits and not force_tiled:
        Bt = _pick_bt(B, per_batch_bytes)             # ~<=4 MiB blocks, grid >= min(4, B)
        grid_len = B // Bt
        channels_last = (HW < 128) and (C >= 128)     # lane-dense layout choice

        needed = 4 * Bt * per_batch_bytes + weight_bytes + (2 << 20)
        vmem_limit = int(min(max(needed, 8 << 20), vmem_limit_cap))

        cost = pl.CostEstimate(
            flops=int(8 * B * C * Cr + 2 * B * C * HW),
            transcendentals=int(2 * B * C),
            bytes_accessed=int(2 * B * C * HW * itemsize + 2 * C * Cr * w_itemsize))

        if channels_last:
            # Layout plumbing: put C on the 128-lane axis so stores are unmasked.
            x_in = jnp.transpose(x.reshape(B, C, HW), (0, 2, 1))    # (B, HW, C)
            out = pl.pallas_call(
                _fused_kernel_channels_last,
                out_shape=jax.ShapeDtypeStruct((B, HW, C), x.dtype),
                grid_spec=pltpu.PrefetchScalarGridSpec(
                    num_scalar_prefetch=0,
                    grid=(grid_len,),
                    in_specs=[
                        pl.BlockSpec((Bt, HW, C), lambda b: (b, 0, 0)),
                        # Constant index_map: weights DMA'd once, stay resident.
                        pl.BlockSpec((C, Cr), lambda b: (0, 0)),
                        pl.BlockSpec((Cr, C), lambda b: (0, 0)),
                    ],
                    out_specs=pl.BlockSpec((Bt, HW, C), lambda b: (b, 0, 0)),
                ),
                compiler_params=pltpu.CompilerParams(
                    dimension_semantics=("parallel",),
                    vmem_limit_bytes=vmem_limit),
                cost_estimate=cost,
            )(x_in, w1_t, w2_t)
            return jnp.transpose(out, (0, 2, 1)).reshape(B, C, H, W)

        x_flat = x.reshape(B, C, HW)
        out_flat = pl.pallas_call(
            _fused_kernel,
            out_shape=jax.ShapeDtypeStruct((B, C, HW), x.dtype),
            grid_spec=pltpu.PrefetchScalarGridSpec(
                num_scalar_prefetch=0,
                grid=(grid_len,),
                in_specs=[
                    pl.BlockSpec((Bt, C, HW), lambda b: (b, 0, 0)),
                    pl.BlockSpec((C, Cr), lambda b: (0, 0)),
                    pl.BlockSpec((Cr, C), lambda b: (0, 0)),
                ],
                out_specs=pl.BlockSpec((Bt, C, HW), lambda b: (b, 0, 0)),
            ),
            compiler_params=pltpu.CompilerParams(
                dimension_semantics=("parallel",),
                vmem_limit_bytes=vmem_limit),
            cost_estimate=cost,
        )(x_flat, w1_t, w2_t)
        return out_flat.reshape(B, C, H, W)

    # ----------------------- tiled fallback (two passes) ----------------------
    x_flat = x.reshape(B, C, HW)
    HW128 = ((HW + 127) // 128) * 128                 # pad <= 127 per row, not a full tile
    tile = _pick_tile(HW128 // 128, C, itemsize)      # ~<=4 MiB, divides HW128, grid >= 4
    n_tiles = HW128 // tile
    padded = HW128 != HW
    if padded:
        # Zero padding: exact for the sum, masked out of the max on the last tile.
        x_flat = jnp.pad(x_flat, ((0, 0), (0, 0), (0, HW128 - HW)))

    vmem_limit_tiled = int(min(
        max(6 * C * tile * itemsize + weight_bytes + (2 << 20), 8 << 20),
        vmem_limit_cap))

    # Pass 1: spatial sum/max accumulation + shared MLP + sigmoid gate.
    # (Optional follow-up: pipeline_mode=pl.Buffered(3) on the x spec if profiling
    #  shows exposed DMA on this read-heavy pass.)
    gate = pl.pallas_call(
        _make_stats_kernel(HW, tile, padded),
        out_shape=jax.ShapeDtypeStruct((B, 1, C), jnp.float32),
        grid_spec=pltpu.PrefetchScalarGridSpec(
            num_scalar_prefetch=0,
            grid=(B, n_tiles),
            in_specs=[
                pl.BlockSpec((1, C, tile), lambda b, j: (b, 0, j)),
                pl.BlockSpec((C, Cr), lambda b, j: (0, 0)),
                pl.BlockSpec((Cr, C), lambda b, j: (0, 0)),
            ],
            out_specs=pl.BlockSpec((1, 1, C), lambda b, j: (b, 0, 0)),
            scratch_shapes=[pltpu.VMEM((1, C), jnp.float32),
                            pltpu.VMEM((1, C), jnp.float32)],
        ),
        compiler_params=pltpu.CompilerParams(
            dimension_semantics=("parallel", "arbitrary"),
            vmem_limit_bytes=vmem_limit_tiled),
        cost_estimate=pl.CostEstimate(
            flops=int(2 * B * C * HW128 + 8 * B * C * Cr),
            transcendentals=int(2 * B * C),
            bytes_accessed=int(B * C * HW128 * itemsize + B * C * 4)),
    )(x_flat, w1_t, w2_t)

    # Pass 2: re-read x tiles and scale by the per-channel gate.
    # When we built a fresh padded copy, let XLA reuse its HBM buffer for the output.
    out_flat = pl.pallas_call(
        _scale_kernel,
        out_shape=jax.ShapeDtypeStruct((B, C, HW128), x.dtype),
        grid_spec=pltpu.PrefetchScalarGridSpec(
            num_scalar_prefetch=0,
            grid=(B, n_tiles),
            in_specs=[
                pl.BlockSpec((1, 1, C), lambda b, j: (b, 0, 0)),
                pl.BlockSpec((1, C, tile), lambda b, j: (b, 0, j)),
            ],
            out_specs=pl.BlockSpec((1, C, tile), lambda b, j: (b, 0, j)),
        ),
        compiler_params=pltpu.CompilerParams(
            dimension_semantics=("parallel", "parallel"),
            vmem_limit_bytes=vmem_limit_tiled),
        cost_estimate=pl.CostEstimate(
            flops=int(B * C * HW128),
            transcendentals=0,
            bytes_accessed=int(2 * B * C * HW128 * itemsize)),
        input_output_aliases=({1: 0} if padded else {}),
    )(gate, x_flat)

    if padded:
        out_flat = out_flat[:, :, :HW]
    return out_flat.reshape(B, C, H, W)


def channel_attention_ref(x, w1, w2):
    """Pure-JAX reference matching the PyTorch forward (bias=False MLP)."""
    B, C, H, W = x.shape
    avg = jnp.mean(x, axis=(2, 3))                    # (B, C)
    mx = jnp.max(x, axis=(2, 3))                      # (B, C)

    def mlp(v):
        return jnp.maximum(v @ w1.T, 0.0) @ w2.T

    att = jax.nn.sigmoid(mlp(avg) + mlp(mx)).reshape(B, C, 1, 1)
    return x * att


if __name__ == "__main__":
    key = jax.random.PRNGKey(0)
    kx, k1, k2, kx2, kx3, k3, k4 = jax.random.split(key, 7)

    # --- Test 1: fast path, HW >= 128 (HW on the lane axis) -------------------
    B, C, H, W = 2, 4, 16, 16
    reduction = 16
    Cr = max(1, C // reduction)
    x = jax.random.normal(kx, (B, C, H, W), dtype=jnp.float32)
    # Deterministic synthetic weights in PyTorch Linear layout (out, in).
    w1 = jax.random.normal(k1, (Cr, C), dtype=jnp.float32) * (1.0 / jnp.sqrt(C))
    w2 = jax.random.normal(k2, (C, Cr), dtype=jnp.float32) * (1.0 / jnp.sqrt(Cr))
    ref = channel_attention_ref(x, w1, w2)
    out = jax.block_until_ready(channel_attention(x, w1, w2))
    assert out.shape == (B, C, H, W)
    assert jnp.allclose(out, ref, atol=1e-5, rtol=1e-5), "fast path mismatch"

    # --- Test 2: tiled fallback, HW = 100 (padded to 128, masked max) ---------
    x2 = jax.random.normal(kx2, (B, C, 10, 10), dtype=jnp.float32)
    ref2 = channel_attention_ref(x2, w1, w2)
    out2 = jax.block_until_ready(channel_attention(x2, w1, w2, force_tiled=True))
    assert out2.shape == (B, C, 10, 10)
    assert jnp.allclose(out2, ref2, atol=1e-5, rtol=1e-5), "tiled path mismatch"

    # --- Test 3: fast path, lane-dense channels-last (HW=49 < 128 <= C=128) ---
    C3 = 128
    Cr3 = max(1, C3 // reduction)
    x3 = jax.random.normal(kx3, (B, C3, 7, 7), dtype=jnp.float32)
    w1_3 = jax.random.normal(k3, (Cr3, C3), dtype=jnp.float32) * (1.0 / jnp.sqrt(C3))
    w2_3 = jax.random.normal(k4, (C3, Cr3), dtype=jnp.float32) * (1.0 / jnp.sqrt(Cr3))
    ref3 = channel_attention_ref(x3, w1_3, w2_3)
    out3 = jax.block_until_ready(channel_attention(x3, w1_3, w2_3))
    assert out3.shape == (B, C3, 7, 7)
    assert jnp.allclose(out3, ref3, atol=1e-4, rtol=1e-4), "channels-last path mismatch"

    print("KERNEL_OK")
</pallas_src>

<mosaic_0001>
module attributes {stable_mosaic.version = 11 : i64} {
  func.func @_fused_kernel(%arg0: i32, %arg1: memref<1x4x256xf32, #tpu.memory_space<vmem>>, %arg2: memref<4x1xf32, #tpu.memory_space<vmem>>, %arg3: memref<1x4xf32, #tpu.memory_space<vmem>>, %arg4: memref<1x4x256xf32, #tpu.memory_space<vmem>>) attributes {dimension_semantics = [#tpu.dimension_semantics<parallel>], iteration_bounds = array<i64: 2>, scalar_prefetch = 0 : i64, scratch_operands = 0 : i64, tpu.core_type = #tpu.core_type<tc>, window_params = [{transform_indices = @transform_0, window_bounds = array<i64: 1, 4, 256>}, {pipeline_mode = #tpu.pipeline_mode<synchronous>, transform_indices = @transform_1, window_bounds = array<i64: 4, 1>}, {pipeline_mode = #tpu.pipeline_mode<synchronous>, transform_indices = @transform_2, window_bounds = array<i64: 1, 4>}, {transform_indices = @transform_3, window_bounds = array<i64: 1, 4, 256>}]} {
    %c0 = arith.constant 0 : index
    %c0_0 = arith.constant 0 : index
    %c0_1 = arith.constant 0 : index
    %0 = vector.load %arg1[%c0, %c0_0, %c0_1] : memref<1x4x256xf32, #tpu.memory_space<vmem>>, vector<1x4x256xf32>
    %cst = arith.constant dense<0.000000e+00> : vector<1x4xf32>
    %1 = vector.multi_reduction <add>, %0, %cst [2] : vector<1x4x256xf32> to vector<1x4xf32>
    %cst_2 = arith.constant 2.560000e+02 : f32
    %2 = vector.broadcast %cst_2 : f32 to vector<1x4xf32>
    %3 = arith.divf %1, %2 : vector<1x4xf32>
    %cst_3 = arith.constant dense<0xFF800000> : vector<1x4xf32>
    %4 = vector.multi_reduction <maximumf>, %0, %cst_3 [2] : vector<1x4x256xf32> to vector<1x4xf32>
    %5 = tpu.concatenate %3, %4 in 0 : vector<1x4xf32>, vector<1x4xf32> -> vector<2x4xf32>
    %c0_4 = arith.constant 0 : index
    %c0_5 = arith.constant 0 : index
    %6 = vector.load %arg2[%c0_4, %c0_5] : memref<4x1xf32, #tpu.memory_space<vmem>>, vector<4x1xf32>
    %cst_6 = arith.constant dense<0.000000e+00> : vector<2x1xf32>
    %7 = tpu.matmul %5, %6, %cst_6 {dimension_numbers = #tpu.dot_dimension_numbers<[1], [0], [0], [1], [0, 0, 1, 1], [], []>} : vector<2x4xf32>, vector<4x1xf32>, vector<2x1xf32> -> vector<2x1xf32>
    %cst_7 = arith.constant 0.000000e+00 : f32
    %8 = vector.broadcast %cst_7 : f32 to vector<2x1xf32>
    %9 = arith.maximumf %7, %8 : vector<2x1xf32>
    %c0_8 = arith.constant 0 : index
    %c0_9 = arith.constant 0 : index
    %10 = vector.load %arg3[%c0_8, %c0_9] : memref<1x4xf32, #tpu.memory_space<vmem>>, vector<1x4xf32>
    %cst_10 = arith.constant dense<0.000000e+00> : vector<2x4xf32>
    %11 = tpu.matmul %9, %10, %cst_10 {dimension_numbers = #tpu.dot_dimension_numbers<[1], [0], [0], [1], [0, 0, 1, 1], [], []>} : vector<2x1xf32>, vector<1x4xf32>, vector<2x4xf32> -> vector<2x4xf32>
    %12 = vector.extract_strided_slice %11 {offsets = [0, 0], sizes = [1, 4], strides = [1, 1]} : vector<2x4xf32> to vector<1x4xf32>
    %13 = vector.extract_strided_slice %11 {offsets = [1, 0], sizes = [1, 4], strides = [1, 1]} : vector<2x4xf32> to vector<1x4xf32>
    %14 = arith.addf %12, %13 : vector<1x4xf32>
    %15 = arith.negf %14 : vector<1x4xf32>
    %16 = math.exp %15 : vector<1x4xf32>
    %cst_11 = arith.constant 1.000000e+00 : f32
    %17 = vector.broadcast %cst_11 : f32 to vector<1x4xf32>
    %18 = arith.addf %17, %16 : vector<1x4xf32>
    %19 = arith.divf %17, %18 : vector<1x4xf32>
    %20 = vector.shape_cast %19 : vector<1x4xf32> to vector<1x4x1xf32>
    %21 = vector.broadcast %20 : vector<1x4x1xf32> to vector<1x4x256xf32>
    %22 = arith.mulf %0, %21 : vector<1x4x256xf32>
    %c0_12 = arith.constant 0 : index
    %c0_13 = arith.constant 0 : index
    %c0_14 = arith.constant 0 : index
    %23 = vector.load %arg4[%c0_12, %c0_13, %c0_14] : memref<1x4x256xf32, #tpu.memory_space<vmem>>, vector<1x4x256xf32>
    tpu.vector_store %arg4[%c0_12, %c0_13, %c0_14], %22 {strides = array<i32>} : memref<1x4x256xf32, #tpu.memory_space<vmem>>, vector<1x4x256xf32>,
    return
  }
  func.func @transform_0(%arg0: i32) -> (i32, i32, i32) {
    %c0_i32 = arith.constant 0 : i32
    %c0_i32_0 = arith.constant 0 : i32
    %c0_i32_1 = arith.constant 0 : i32
    return %arg0, %c0_i32, %c0_i32_0 : i32, i32, i32
  }
  func.func @transform_1(%arg0: i32) -> (i32, i32) {
    %c0_i32 = arith.constant 0 : i32
    %c0_i32_0 = arith.constant 0 : i32
    %c0_i32_1 = arith.constant 0 : i32
    return %c0_i32, %c0_i32_0 : i32, i32
  }
  func.func @transform_2(%arg0: i32) -> (i32, i32) {
    %c0_i32 = arith.constant 0 : i32
    %c0_i32_0 = arith.constant 0 : i32
    %c0_i32_1 = arith.constant 0 : i32
    return %c0_i32, %c0_i32_0 : i32, i32
  }
  func.func @transform_3(%arg0: i32) -> (i32, i32, i32) {
    %c0_i32 = arith.constant 0 : i32
    %c0_i32_0 = arith.constant 0 : i32
    %c0_i32_1 = arith.constant 0 : i32
    return %arg0, %c0_i32, %c0_i32_0 : i32, i32, i32
  }
}

</mosaic_0001>

<bundles_post_ra>
// kernel: tpu_custom_call.1
= control target key start
LH: loop header
LB: loop body
LE: loop exit
PB: predicated region body
PF: predicated region fallthrough
CT: control target
= control target key end

     0   :  { %8 = vsyncpa [#allocation3], 0  ;;  %s756_s0 = inlined_call_operand.hbm [shape: f32[2,4,256], index: 0, kind: input, shape index: {}]   ;;  %s757_s1 = inlined_call_operand.vmem [shape: f32[4,1], index: 1, kind: input, shape index: {}]   ;;  %s758_s2 = inlined_call_operand.vmem [shape: f32[1,4], index: 2, kind: input, shape index: {}]   ;;  %s759_s3 = inlined_call_operand.hbm [shape: f32[2,4,256], index: 3, kind: output, shape index: {}]  }
   0x1   :  { %10 = vsyncpa [#allocation3 + $0x1], 0 }
   0x2   :  { %11 = vsyncpa [#allocation4], 0 }
   0x3   :  { %13 = vsyncpa [#allocation4 + $0x1], 0  ;;  %s609_s12 = smov 0   ;;  %s611_s13 = smov 0  }
   0x4   :  { %s613_s14 = smov 0   ;;  %s615_s15 = smov 0  }
   0x5 LB: > { %s630_s16 = sadd.s32 4294967295, %s585_s15   ;;  %s412_s17 = sadd.s32 4294967294, %s585_s15   ;;  %s585_s15 = sphi %s615_s15, %s769_s15   ;;  %s581_s14 = sphi %s613_s14, %s768_s14   ;;  %s577_s13 = sphi %s611_s13, %s767_s13   ;;  %s573_s12 = sphi %s609_s12, %s766_s12  }
   0x6   : > { %s634_s18 = sadd.s32 1, %s585_s15   ;;  %s26_s19 = sadd.s32 1, %s581_s14 }
   0x7   : > { %s23_s20 = ssub.s32 %s585_s15, %s634_s18  ;;  %p33_p0 = scmp.ne.s32.totalorder %s581_s14, %s577_s13 }
   0x8   : > { %p24_p1 = scmp.eq.s32.totalorder %s23_s20, 0  ;;  %p34_p2 = scmp.eq.s32.totalorder %s585_s15, 0 }
   0x9   : > { %p39_p3 = scmp.ne.s32.totalorder %s577_s13, %s573_s12  ;;  %p40_p4 = scmp.eq.s32.totalorder %s630_s16, 0 }
   0xa   : > { %s646_s21 = scalar_select %p24_p1, %s581_s14, %s26_s19  }
   0xb   : > { %p648_p5 = por %p34_p2, %p33_p0  ;;  %p652_p6 = por %p40_p4, %p39_p3 }
   0xc   : > { %p105_p7 = scmp.eq.s32.totalorder %s630_s16, 1  ;;  %p111_p8 = scmp.eq.s32.totalorder %s412_s17, 1 }
   0xd   : > { %p445_p10 = scmp.lt.s32.totalorder %s585_s15, 2  ;;  %s137_s26 = sand.u32 1, %s581_s14  }
   0xe   : > { %p659_p11 = por %p105_p7, %p33_p0  ;;  %p663_p12 = por %p111_p8, %p39_p3 }
   0xf   : > { %s431_s27 = sshll.u32 %s585_s15, 3  ;;  %s415_s28 = sshll.u32 %s137_s26, 3 }
  0x10   : > { %s146_s4 = scalar_lea.hbm %s756_s0, %s431_s27  ;;  %s141_s6 = scalar_lea.vmem [#allocation2], %s415_s28 }
  0x11   : > { %s148_s5 = sshll.u32 %s146_s4, 4  ;;  %s150_s7 = sshll.u32 %s141_s6, 4  ;;  %s149_s5 = int_to_ptr.hbm [resolvable:$true] %s148_s5  ;;  %s151_s7 = int_to_ptr.vmem [resolvable:$true] %s150_s7 }
  0x12   : > { %p674_p13 = pnand %p445_p10, %p648_p5  ;;  %p418_p0 = scmp.ge.s32.totalorder %s585_s15, 1 }
  0x13   : > { %p155_p1 = scmp.lt.s32.totalorder %s585_s15, 3  ;;  %s138_s9 = scalar_lea.sflag [#allocation3], %s137_s26 }
  0x14   : > { %s489_s10 = sshra.s32 %s149_s5, 4  ;;  %p493_p3 = pneg %p674_p13  ;;  %s490_s10 = int_to_ptr.hbm [resolvable:$true] %s489_s10 }
  0x15   : > { %s491_s11 = scalar_lea.hbm %s490_s10, 8  ;;  %s496_s20 = scalar_lea.hbm %s756_s0, 16 }
  0x16   : > { %p492_p2 = scmp.ne.s32.totalorder %s490_s10, %s491_s11  ;;  %p497_p5 = scmp.lt.s32.totalorder %s490_s10, %s756_s0 }
  0x17   : > { %p498_p8 = scmp.lt.s32.totalorder %s496_s20, %s491_s11 }
  0x18   : > { %p494_p4 = pnand %p493_p3, %p492_p2 }
  0x19   : > { %p499_p10 = por %p498_p8, %p497_p5 }
  0x1a   : > { %p495_p7 = pneg %p494_p4 }
  0x1c   : > { %p500_p9 = pnand %p499_p10, %p495_p7 }
  0x1e   : > { %503 = shalt.err (!%p500_p9)
}
  0x1f   : > { %440 = dma.hbm_to_vmem [thread:$0]  (!%p674_p13), %s149_s5, 128, %s151_s7, %s138_s9  }
  0x20   : > { %p156_p2 = pnand %p418_p0, %p155_p1 }
  0x21   : > { %s695_s26 = sand.u32 (!%p156_p2), 1, %s577_s13  }
  0x22   : > { %159 = sbr.rel (%p156_p2) target bundleno = 589 (0x24d), region = 32  ;;  %s419_s28 = sshll.u32 (!%p156_p2), %s695_s26, 3 }
  0x23   : > { %s162_s29 = scalar_lea.sflag (!%p156_p2), [#allocation3], %s695_s26  ;;  %s165_s30 = scalar_lea.vmem (!%p156_p2), [#allocation2], %s419_s28 }
  0x27   : > { %564 = dma.done.wait (%p652_p6), %s162_s29, 128  }
  0x28   : > { %566 = vsyncadd (%p652_p6), %s162_s29, 4294967168  ;;  %v705_v0 = vld [vmem:[%s165_s30] sm:$0xff]  ;;  %vm196_vm0 = vcmask 1043456   ;;  %v587_v11 = vmov 256.0   ;;  %v230_v12 = vld [vmem:[%s757_s1] sm:$0xf]  ;;  %v221_v19 = vlaneseq }
  0x29   : > { %191 = vst [vmem:[#allocation1] ss:$2 sm:$0xff] %v705_v0  ;;  %483 = vrcp.f32 %v587_v11  ;;  %421 = vmatpush.msk.msra.mxu0 %vm196_vm0, %v230_v12  ;;  %vm228_vm2 = vcmask 1040384   ;;  %vm231_vm3 = vcmask 31744   ;;  %v259_v27 = vld [vmem:[%s758_s2] sm:$0x1] }
  0x2a   : > { %v222_v21 = vand.u32 127, %v221_v19  ;;  %423 = vmatpush.msk.msra.mxu1 %vm228_vm2, %v259_v27  ;;  %vm260_vm4 = vcmask 7168   ;;  %v312_v30 = vshrl.u32 %v221_v19, 7  ;;  %v588_v48 = vmov 839922192   ;;  %s432_s7 = sshll.u32 %s630_s16, 3 }
  0x2b   : > { %v319_v49 = vunpack.c.l.s4 %v588_v48  ;;  %s337_s10 = scalar_lea.hbm %s759_s3, %s432_s7  ;;  %s188_s11 = scalar_lea.vmem [#allocation5], %s419_s28 }
  0x2c   : > { %481 = vset.pattern.permute.xlu1 %v312_v30  ;;  %482 = vset.pattern.permute.xlu0 %v312_v30  ;;  %s339_s17 = sshll.u32 %s188_s11, 4  ;;  %s341_s19 = sshll.u32 %s337_s10, 4  ;;  %s340_s17 = int_to_ptr.vmem [resolvable:$true] %s339_s17  ;;  %s342_s19 = int_to_ptr.hbm [resolvable:$true] %s341_s19 }
  0x2d   : > { %v320_v50 = vunpack.c.0.s8 %v319_v49  ;;  %s326_s20 = scalar_lea.sflag [#allocation4], %s695_s26  ;;  %s533_s22 = sshra.s32 %s342_s19, 4  ;;  %s534_s22 = int_to_ptr.hbm [resolvable:$true] %s533_s22 }
  0x2e   : > { %s535_s16 = scalar_lea.hbm %s534_s22, 8  ;;  %s539_s28 = scalar_lea.hbm %s759_s3, 16 }
  0x2f   : > { %v484_v13 = vpop.eup %483  ;;  %p536_p6 = scmp.ne.s32.totalorder %s534_s22, %s535_s16  ;;  %p540_p0 = scmp.lt.s32.totalorder %s534_s22, %s759_s3 }
  0x30   : > { %v192_v1 = vld.sshfl [vmem:[#allocation1] sm:$0xff pattern:$0x75316420]  ;;  %v193_v2 = vld.sshfl [vmem:[#allocation1 + $0x8] sm:$0xff pattern:$0x75316420]  ;;  %vm207_vm1 = vweird.f32 %v484_v13  ;;  %p541_p1 = scmp.lt.s32.totalorder %s539_s28, %s535_s16 }
  0x31   : > { %v197_v3 = vsel %vm196_vm0, %v192_v1, 0.0  ;;  %v198_v4 = vsel %vm196_vm0, %v193_v2, 0.0  ;;  %210 = vst [vmem:[#allocation1] ss:$2 sm:$0xff] %v705_v0  ;;  %v203_v14 = vmul.f32 256.0, %v484_v13  ;;  %p537_p9 = pnand %p536_p6, %p659_p11 }
  0x32   : > { %v199_v5 = vadd.f32 %v198_v4, %v197_v3  ;;  %p542_p3 = por %p541_p1, %p540_p0 }
  0x33   : > { %v204_v15 = vsub.f32 1.0, %v203_v14  ;;  %p538_p13 = pneg %p537_p9 }
  0x34   : > { %200 = vadd.xlane.f32.xlu0 %v199_v5 }
  0x35   : > { %v205_v16 = vmul.f32 %v484_v13, %v204_v15  ;;  %p543_p4 = pnand %p542_p3, %p538_p13 }
  0x37   : > { %v206_v17 = vadd.f32 %v484_v13, %v205_v16 }
  0x38   : > { %v211_v6 = vld.sshfl [vmem:[#allocation1] sm:$0xff pattern:$0x75316420]  ;;  %v212_v7 = vld.sshfl [vmem:[#allocation1 + $0x8] sm:$0xff pattern:$0x75316420] }
  0x39   : > { %v215_v8 = vsel %vm196_vm0, %v211_v6, -inf  ;;  %v216_v9 = vsel %vm196_vm0, %v212_v7, -inf  ;;  %v208_v20 = vsel %vm207_vm1, %v484_v13, %v206_v17 }
  0x3a   : > { %v217_v10 = vmax.f32 %v215_v8, %v216_v9 }
  0x3c   : > { %218 = vmax.xlane.f32.xlu0 %v217_v10 }
  0xa7   : > { %v201_v18 = vpop.xlane.xlu0 %200 }
  0xa8   : > { %v209_v22 = vmul.f32 %v208_v20, %v201_v18 }
  0xaa   : > { %v223_v24 = vperm.slane %v209_v22, %v222_v21 }
  0xaf   : > { %v219_v23 = vpop.xlane.xlu0 %218 }
  0xb0   : > { %v226_v25 = vperm.slane %v219_v23, %v222_v21 }
  0xb2   : > { %v229_v26 = vsel %vm228_vm2, %v223_v24, %v226_v25 }
  0xb3   : > { %422 = vmatmul.msk.f32.vlgmr.msra.gmra.mxu0 %vm231_vm3, %v229_v26 }
 0x130   : > { %v255_v28 = vpop.f32.mrf.mxu0 }
 0x131   : > { %v258_v29 = vmax.f32 %v255_v28, 0.0 }
 0x133   : > { %424 = vmatmul.msk.f32.vlgmr.msra.gmra.mxu1 %vm260_vm4, %v258_v29 }
 0x1b0   : > { %v284_v31 = vpop.f32.mrf.mxu1 }
 0x1b1   : > { %v288_v32 = vrot.slane %v284_v31, 1 }
 0x1b3   : > { %v290_v33 = vadd.f32 %v288_v32, %v284_v31 }
 0x1b5   : > { %v425_v34 = vmul.f32 -1.442695, %v290_v33 }
 0x1b7   : > { %485 = vpow2.f32 %v425_v34 }
 0x1bd   : > { %v486_v35 = vpop.eup %485 }
 0x1be   : > { %v294_v36 = vadd.f32 1.0, %v486_v35 }
 0x1c0   : > { %487 = vrcp.f32 %v294_v36  ;;  %v306_v40 = vand.u32 2147483648, %v294_v36  ;;  %v304_v42 = vand.u32 2147483647, %v294_v36  ;;  %vm300_vm6 = vweird.f32 %v294_v36 }
 0x1c2   : > { %v307_v44 = vor.u32 1.1754944e-38, %v306_v40  ;;  %vm305_vm8 = vcmp.eq.f32.partialorder %v304_v42, 8.507059e+37 }
 0x1c6   : > { %v488_v37 = vpop.eup %487 }
 0x1c7   : > { %v296_v38 = vmul.f32 %v488_v37, %v294_v36  ;;  %vm301_vm5 = vweird.f32 %v488_v37 }
 0x1c8   : > { %vm302_vm7 = vmor %vm300_vm6, %vm301_vm5 }
 0x1c9   : > { %v297_v39 = vsub.f32 1.0, %v296_v38 }
 0x1cb   : > { %v298_v41 = vmul.f32 %v488_v37, %v297_v39 }
 0x1cd   : > { %v299_v43 = vadd.f32 %v488_v37, %v298_v41 }
 0x1cf   : > { %v303_v45 = vsel %vm302_vm7, %v488_v37, %v299_v43 }
 0x1d0   : > { %v308_v46 = vsel %vm305_vm8, %v307_v44, %v303_v45 }
 0x1d1   : > { %v310_v47 = vperm.slane %v308_v46, 0 }
 0x1d3   : > { %315 = vperm.xlu1 %481, %v310_v47  }
 0x245   : > { %v316_v51 = vpop.permute.xlu1 %315 }
 0x246   : > { %v321_v52 = vperm.slane %v316_v51, %v320_v50 }
 0x248   : > { %v323_v53 = vmul.f32 %v321_v52, %v705_v0 }
 0x24a   : > { %324 = vst [vmem:[%s188_s11] sm:$0xff] %v323_v53 }
 0x24b   : > { %546 = shalt.err (!%p543_p4)
}
 0x24c   : > { %435 = dma.vmem_to_hbm [thread:$0]  (%p659_p11), %s340_s17, 128, %s342_s19, %s326_s20  }
 0x24d PF: > { %s353_s26 = sand.u32 1, %s573_s12   ;;  %p765_p7 = scmp.ge.s32.totalorder %s585_s15, 2 }
 0x24e   : > { %s354_s4 = scalar_lea.sflag [#allocation4], %s353_s26 }
 0x24f   : > { %p442_p5 = pnand %p765_p7, %p663_p12 }
 0x251   : > { %p443_p8 = pneg %p442_p5 }
 0x253   : > { %568 = dma.done.wait (%p443_p8), %s354_s4, 128  }
 0x254   : > { %570 = vsyncadd (%p443_p8), %s354_s4, 4294967168  ;;  %p16_p10 = scmp.ge.s32.totalorder %s634_s18, 4   ;;  %s766_s12 = smov %s577_s13 }
 0x255   : > { %s767_s13 = smov %s581_s14  ;;  %s768_s14 = smov %s646_s21 }
 0x256   : > { %s769_s15 = smov %s634_s18  ;;  %18 = sbr.rel (!%p16_p10) target bundleno = 5 (0x5), region = 77 }
 0x25b   :  { %360 = vsyncpa [#allocation3], 1 }
 0x25c   :  { %362 = vsyncpa [#allocation3 + $0x1], 1 }
 0x25d   :  { %363 = vsyncpa [#allocation4], 1 }
 0x25e   :  { %365 = vsyncpa [#allocation4 + $0x1], 1 }

</bundles_post_ra>
